<compile_context>
chip_gen: v5e
topology: v5e:2x2
jax: 0.10.0
libtpu: 0.0.40
codegen_flags: <defaults>
</compile_context>

<pallas_src>
import functools

import jax
import jax.numpy as jnp
from jax.experimental import pallas as pl
from jax.experimental.pallas import tpu as pltpu

LANE = 128


def _round_up(n, m):
    return ((n + m - 1) // m) * m


def _mlp_kernel(x_ref, w1_ref, b1_ref, w2_ref, b2_ref, w3_ref, b3_ref, o_ref):
    # Three MXU matmuls (bf16 operands, f32 accumulation); bias + ReLU on the VPU.
    x = x_ref[...]
    h1 = jnp.dot(x, w1_ref[...], preferred_element_type=jnp.float32) + b1_ref[...]
    h1 = jnp.maximum(h1, 0.0).astype(x.dtype)
    h2 = jnp.dot(h1, w2_ref[...], preferred_element_type=jnp.float32) + b2_ref[...]
    h2 = jnp.maximum(h2, 0.0).astype(x.dtype)
    out = jnp.dot(h2, w3_ref[...], preferred_element_type=jnp.float32) + b3_ref[...]
    o_ref[...] = out.astype(o_ref.dtype)


def prepare_params(params, compute_dtype=jnp.bfloat16):
    """One-time prep (outside the per-call jit): pad every weight/bias lane dim to a
    multiple of 128 and cast the weight matrices to the MXU compute dtype.
    Zero padding keeps the math identical; padded output columns are sliced off
    outside the kernel.  Returns (prepared_params, out_features)."""

    def pad_to(a, rows, cols, dtype):
        r, c = a.shape
        return jnp.pad(a, ((0, rows - r), (0, cols - c))).astype(dtype)

    w1, b1 = params["w1"], params["b1"]
    w2, b2 = params["w2"], params["b2"]
    w3, b3 = params["w3"], params["b3"]
    F, H1 = w1.shape
    H2, OUT = w2.shape[1], w3.shape[1]
    H1p, H2p, OUTp = _round_up(H1, LANE), _round_up(H2, LANE), _round_up(OUT, LANE)

    prepared = {
        "w1": pad_to(w1, F, H1p, compute_dtype),
        "b1": pad_to(b1, 1, H1p, jnp.float32),   # biases stay f32 (added to f32 acc)
        "w2": pad_to(w2, H1p, H2p, compute_dtype),
        "b2": pad_to(b2, 1, H2p, jnp.float32),
        "w3": pad_to(w3, H2p, OUTp, compute_dtype),
        "b3": pad_to(b3, 1, OUTp, jnp.float32),
    }
    return prepared, OUT


@functools.partial(jax.jit, static_argnames=("out_features", "block_b"))
def choro_mlp_forward(x, prepared, out_features, block_b=128):
    """x: [B, F] float32.  prepared: output of prepare_params."""
    B, F = x.shape
    w1, b1 = prepared["w1"], prepared["b1"]
    w2, b2 = prepared["w2"], prepared["b2"]
    w3, b3 = prepared["w3"], prepared["b3"]
    H1p, H2p, OUTp = w1.shape[1], w2.shape[1], w3.shape[1]
    compute_dtype = w1.dtype

    xc = x.astype(compute_dtype)
    B_pad = _round_up(B, block_b)
    if B_pad != B:
        # Rows are independent, so zero-padding the ragged last batch tile is safe.
        xc = jnp.pad(xc, ((0, B_pad - B), (0, 0)))

    grid = (B_pad // block_b,)

    itemsize = jnp.dtype(compute_dtype).itemsize
    flops = 2 * B_pad * (F * H1p + H1p * H2p + H2p * OUTp)
    bytes_accessed = (
        B_pad * F * itemsize
        + (F * H1p + H1p * H2p + H2p * OUTp) * itemsize
        + (H1p + H2p + OUTp) * 4
        + B_pad * OUTp * 4
    )

    # Weights easily fit in VMEM at these sizes and stay resident (constant index_map).
    # TODO(synk): for large F/H1 on v7x (64 MiB VMEM) add a K-tiled "arbitrary"
    # reduction axis + pl.when-guarded f32 accumulator and set vmem_limit_bytes.
    out_padded = pl.pallas_call(
        _mlp_kernel,
        out_shape=jax.ShapeDtypeStruct((B_pad, OUTp), jnp.float32),
        grid=grid,
        in_specs=[
            pl.BlockSpec((block_b, F), lambda i: (i, 0)),   # x tile
            pl.BlockSpec((F, H1p), lambda i: (0, 0)),       # w1 (resident)
            pl.BlockSpec((1, H1p), lambda i: (0, 0)),       # b1
            pl.BlockSpec((H1p, H2p), lambda i: (0, 0)),     # w2
            pl.BlockSpec((1, H2p), lambda i: (0, 0)),       # b2
            pl.BlockSpec((H2p, OUTp), lambda i: (0, 0)),    # w3
            pl.BlockSpec((1, OUTp), lambda i: (0, 0)),      # b3
        ],
        out_specs=pl.BlockSpec((block_b, OUTp), lambda i: (i, 0)),  # lane-dense (128) slab
        compiler_params=pltpu.CompilerParams(
            dimension_semantics=("parallel",),
        ),
        cost_estimate=pl.CostEstimate(
            flops=flops, transcendentals=0, bytes_accessed=bytes_accessed
        ),
    )(xc, w1, b1, w2, b2, w3, b3)

    return out_padded[:B, :out_features]


def init_params(key, input_size, hidden_sizes):
    """Deterministic synthetic init matching nn.Linear shapes (weights stored [in, out])."""
    h0, h1 = hidden_sizes
    out = 2
    ks = jax.random.split(key, 6)

    def uniform_like_torch(k, fan_in, shape):
        bound = 1.0 / jnp.sqrt(jnp.float32(fan_in))
        return jax.random.uniform(k, shape, jnp.float32, -bound, bound)

    return {
        "w1": uniform_like_torch(ks[0], input_size, (input_size, h0)),
        "b1": uniform_like_torch(ks[1], input_size, (1, h0)),
        "w2": uniform_like_torch(ks[2], h0, (h0, h1)),
        "b2": uniform_like_torch(ks[3], h0, (1, h1)),
        "w3": uniform_like_torch(ks[4], h1, (h1, out)),
        "b3": uniform_like_torch(ks[5], h1, (1, out)),
    }


def _reference_forward_f32(x, p):
    h1 = jnp.maximum(x @ p["w1"] + p["b1"], 0.0)
    h2 = jnp.maximum(h1 @ p["w2"] + p["b2"], 0.0)
    return h2 @ p["w3"] + p["b3"]


def _reference_forward_bf16(x, p):
    """Same quantization as the kernel: bf16 operands, f32 accumulation, f32 bias."""
    def dot(a, w):
        return jnp.dot(a.astype(jnp.bfloat16), w.astype(jnp.bfloat16),
                       preferred_element_type=jnp.float32)
    h1 = jnp.maximum(dot(x, p["w1"]) + p["b1"], 0.0)
    h2 = jnp.maximum(dot(h1, p["w2"]) + p["b2"], 0.0)
    return dot(h2, p["w3"]) + p["b3"]


if __name__ == "__main__":
    key = jax.random.PRNGKey(0)
    k_x, k_p = jax.random.split(key)

    # X was flattened to [N, input_size] in the original script.
    batch = 256            # -> grid=(2,): both v7x TensorCores get a batch tile
    input_size = 64
    hidden_sizes = (32, 16)
    block_b = 128          # multiple of 16 (bf16 sublane packing)

    x = jax.random.normal(k_x, (batch, input_size), dtype=jnp.float32)
    params = init_params(k_p, input_size, hidden_sizes)

    prepared, out_features = prepare_params(params, compute_dtype=jnp.bfloat16)

    out = choro_mlp_forward(x, prepared, out_features, block_b=block_b)
    out = jax.block_until_ready(out)
    assert out.shape == (batch, out_features), out.shape

    # Kernel math vs a bf16-consistent reference (tight) ...
    ref_bf16 = _reference_forward_bf16(x, params)
    assert jnp.allclose(out, ref_bf16, atol=2e-3, rtol=2e-3), "mismatch vs bf16 reference"
    # ... and vs the pure-f32 reference (loose: bf16 quantization error only).
    ref_f32 = _reference_forward_f32(x, params)
    assert jnp.allclose(out, ref_f32, atol=5e-2, rtol=5e-2), "mismatch vs f32 reference"

    print("KERNEL_OK")
</pallas_src>

<mosaic_0001>
module attributes {stable_mosaic.version = 11 : i64} {
  func.func @_mlp_kernel(%arg0: i32, %arg1: memref<128x64xbf16, #tpu.memory_space<vmem>>, %arg2: memref<64x128xbf16, #tpu.memory_space<vmem>>, %arg3: memref<1x128xf32, #tpu.memory_space<vmem>>, %arg4: memref<128x128xbf16, #tpu.memory_space<vmem>>, %arg5: memref<1x128xf32, #tpu.memory_space<vmem>>, %arg6: memref<128x128xbf16, #tpu.memory_space<vmem>>, %arg7: memref<1x128xf32, #tpu.memory_space<vmem>>, %arg8: memref<128x128xf32, #tpu.memory_space<vmem>>) attributes {dimension_semantics = [#tpu.dimension_semantics<parallel>], iteration_bounds = array<i64: 2>, scalar_prefetch = 0 : i64, scratch_operands = 0 : i64, tpu.core_type = #tpu.core_type<tc>, window_params = [{transform_indices = @transform_0, window_bounds = array<i64: 128, 64>}, {pipeline_mode = #tpu.pipeline_mode<synchronous>, transform_indices = @transform_1, window_bounds = array<i64: 64, 128>}, {pipeline_mode = #tpu.pipeline_mode<synchronous>, transform_indices = @transform_2, window_bounds = array<i64: 1, 128>}, {pipeline_mode = #tpu.pipeline_mode<synchronous>, transform_indices = @transform_3, window_bounds = array<i64: 128, 128>}, {pipeline_mode = #tpu.pipeline_mode<synchronous>, transform_indices = @transform_4, window_bounds = array<i64: 1, 128>}, {pipeline_mode = #tpu.pipeline_mode<synchronous>, transform_indices = @transform_5, window_bounds = array<i64: 128, 128>}, {pipeline_mode = #tpu.pipeline_mode<synchronous>, transform_indices = @transform_6, window_bounds = array<i64: 1, 128>}, {transform_indices = @transform_7, window_bounds = array<i64: 128, 128>}]} {
    %c0 = arith.constant 0 : index
    %c0_0 = arith.constant 0 : index
    %0 = vector.load %arg1[%c0, %c0_0] : memref<128x64xbf16, #tpu.memory_space<vmem>>, vector<128x64xbf16>
    %c0_1 = arith.constant 0 : index
    %c0_2 = arith.constant 0 : index
    %1 = vector.load %arg2[%c0_1, %c0_2] : memref<64x128xbf16, #tpu.memory_space<vmem>>, vector<64x128xbf16>
    %cst = arith.constant dense<0.000000e+00> : vector<128x128xf32>
    %2 = tpu.matmul %0, %1, %cst {dimension_numbers = #tpu.dot_dimension_numbers<[1], [0], [0], [1], [0, 0, 1, 1], [], []>} : vector<128x64xbf16>, vector<64x128xbf16>, vector<128x128xf32> -> vector<128x128xf32>
    %c0_3 = arith.constant 0 : index
    %c0_4 = arith.constant 0 : index
    %3 = vector.load %arg3[%c0_3, %c0_4] : memref<1x128xf32, #tpu.memory_space<vmem>>, vector<1x128xf32>
    %4 = vector.broadcast %3 : vector<1x128xf32> to vector<128x128xf32>
    %5 = arith.addf %2, %4 : vector<128x128xf32>
    %cst_5 = arith.constant 0.000000e+00 : f32
    %6 = vector.broadcast %cst_5 : f32 to vector<128x128xf32>
    %7 = arith.maximumf %5, %6 : vector<128x128xf32>
    %8 = arith.truncf %7 : vector<128x128xf32> to vector<128x128xbf16>
    %c0_6 = arith.constant 0 : index
    %c0_7 = arith.constant 0 : index
    %9 = vector.load %arg4[%c0_6, %c0_7] : memref<128x128xbf16, #tpu.memory_space<vmem>>, vector<128x128xbf16>
    %cst_8 = arith.constant dense<0.000000e+00> : vector<128x128xf32>
    %10 = tpu.matmul %8, %9, %cst_8 {dimension_numbers = #tpu.dot_dimension_numbers<[1], [0], [0], [1], [0, 0, 1, 1], [], []>} : vector<128x128xbf16>, vector<128x128xbf16>, vector<128x128xf32> -> vector<128x128xf32>
    %c0_9 = arith.constant 0 : index
    %c0_10 = arith.constant 0 : index
    %11 = vector.load %arg5[%c0_9, %c0_10] : memref<1x128xf32, #tpu.memory_space<vmem>>, vector<1x128xf32>
    %12 = vector.broadcast %11 : vector<1x128xf32> to vector<128x128xf32>
    %13 = arith.addf %10, %12 : vector<128x128xf32>
    %cst_11 = arith.constant 0.000000e+00 : f32
    %14 = vector.broadcast %cst_11 : f32 to vector<128x128xf32>
    %15 = arith.maximumf %13, %14 : vector<128x128xf32>
    %16 = arith.truncf %15 : vector<128x128xf32> to vector<128x128xbf16>
    %c0_12 = arith.constant 0 : index
    %c0_13 = arith.constant 0 : index
    %17 = vector.load %arg6[%c0_12, %c0_13] : memref<128x128xbf16, #tpu.memory_space<vmem>>, vector<128x128xbf16>
    %cst_14 = arith.constant dense<0.000000e+00> : vector<128x128xf32>
    %18 = tpu.matmul %16, %17, %cst_14 {dimension_numbers = #tpu.dot_dimension_numbers<[1], [0], [0], [1], [0, 0, 1, 1], [], []>} : vector<128x128xbf16>, vector<128x128xbf16>, vector<128x128xf32> -> vector<128x128xf32>
    %c0_15 = arith.constant 0 : index
    %c0_16 = arith.constant 0 : index
    %19 = vector.load %arg7[%c0_15, %c0_16] : memref<1x128xf32, #tpu.memory_space<vmem>>, vector<1x128xf32>
    %20 = vector.broadcast %19 : vector<1x128xf32> to vector<128x128xf32>
    %21 = arith.addf %18, %20 : vector<128x128xf32>
    %c0_17 = arith.constant 0 : index
    %c0_18 = arith.constant 0 : index
    %22 = vector.load %arg8[%c0_17, %c0_18] : memref<128x128xf32, #tpu.memory_space<vmem>>, vector<128x128xf32>
    tpu.vector_store %arg8[%c0_17, %c0_18], %21 {strides = array<i32>} : memref<128x128xf32, #tpu.memory_space<vmem>>, vector<128x128xf32>,
    return
  }
  func.func @transform_0(%arg0: i32) -> (i32, i32) {
    %c0_i32 = arith.constant 0 : i32
    %c0_i32_0 = arith.constant 0 : i32
    return %arg0, %c0_i32 : i32, i32
  }
  func.func @transform_1(%arg0: i32) -> (i32, i32) {
    %c0_i32 = arith.constant 0 : i32
    %c0_i32_0 = arith.constant 0 : i32
    %c0_i32_1 = arith.constant 0 : i32
    return %c0_i32, %c0_i32_0 : i32, i32
  }
  func.func @transform_2(%arg0: i32) -> (i32, i32) {
    %c0_i32 = arith.constant 0 : i32
    %c0_i32_0 = arith.constant 0 : i32
    %c0_i32_1 = arith.constant 0 : i32
    return %c0_i32, %c0_i32_0 : i32, i32
  }
  func.func @transform_3(%arg0: i32) -> (i32, i32) {
    %c0_i32 = arith.constant 0 : i32
    %c0_i32_0 = arith.constant 0 : i32
    %c0_i32_1 = arith.constant 0 : i32
    return %c0_i32, %c0_i32_0 : i32, i32
  }
  func.func @transform_4(%arg0: i32) -> (i32, i32) {
    %c0_i32 = arith.constant 0 : i32
    %c0_i32_0 = arith.constant 0 : i32
    %c0_i32_1 = arith.constant 0 : i32
    return %c0_i32, %c0_i32_0 : i32, i32
  }
  func.func @transform_5(%arg0: i32) -> (i32, i32) {
    %c0_i32 = arith.constant 0 : i32
    %c0_i32_0 = arith.constant 0 : i32
    %c0_i32_1 = arith.constant 0 : i32
    return %c0_i32, %c0_i32_0 : i32, i32
  }
  func.func @transform_6(%arg0: i32) -> (i32, i32) {
    %c0_i32 = arith.constant 0 : i32
    %c0_i32_0 = arith.constant 0 : i32
    %c0_i32_1 = arith.constant 0 : i32
    return %c0_i32, %c0_i32_0 : i32, i32
  }
  func.func @transform_7(%arg0: i32) -> (i32, i32) {
    %c0_i32 = arith.constant 0 : i32
    %c0_i32_0 = arith.constant 0 : i32
    return %arg0, %c0_i32 : i32, i32
  }
}

</mosaic_0001>

<bundles_post_ra>
// kernel: choro_mlp_forward.1
= control target key start
LH: loop header
LB: loop body
LE: loop exit
PB: predicated region body
PF: predicated region fallthrough
CT: control target
= control target key end

     0   :  { %s1037_s24 = smov 0   ;;  %s1181_s0 = inlined_call_operand.vmem [shape: bf16[256,64], index: 0, kind: input, shape index: {}]   ;;  %s1182_s1 = inlined_call_operand.vmem [shape: bf16[64,128], index: 1, kind: input, shape index: {}]   ;;  %s1183_s2 = inlined_call_operand.vmem [shape: f32[1,128], index: 2, kind: input, shape index: {}]   ;;  %s1184_s3 = inlined_call_operand.vmem [shape: bf16[128,128], index: 3, kind: input, shape index: {}]   ;;  %s1185_s4 = inlined_call_operand.vmem [shape: f32[1,128], index: 4, kind: input, shape index: {}]   ;;  %s1186_s5 = inlined_call_operand.vmem [shape: bf16[128,128], index: 5, kind: input, shape index: {}]   ;;  %s1187_s6 = inlined_call_operand.vmem [shape: f32[1,128], index: 6, kind: input, shape index: {}]   ;;  %s1188_s7 = inlined_call_operand.vmem [shape: f32[256,128], index: 7, kind: output, shape index: {}]  }
   0x1 LB: > { %s803_s25 = sadd.s32 4294967295, %s995_s24   ;;  %p807_p0 = scmp.ge.s32.totalorder %s995_s24, 1  ;;  %s995_s24 = sphi %s1037_s24, %s17_s24  }
   0x2   : > { %p238_p1 = scmp.lt.s32.totalorder %s995_s24, 3 }
   0x4   : > { %p239_p2 = pnand %p807_p0, %p238_p1 }
   0x5   : > { %s808_s28 = sshll.u32 (!%p239_p2), %s803_s25, 4 }
   0x6   : > { %242 = sbr.rel (%p239_p2) target bundleno = 568 (0x238), region = 48  ;;  %p271_p3 = scmp.lt.s32.totalorder (!%p239_p2), %s808_s28, 31 }
   0xb   : > { %v945_v0 = vld [vmem:[%s1182_s1 + $0x18] sm:$0xff]  ;;  %v944_v1 = vld [vmem:[%s1182_s1 + $0x10] sm:$0xff]  ;;  %s1190_s28 = smov (!%p271_p3, %s808_s28), 31  ;;  %v943_v2 = vld [vmem:[%s1182_s1 + $0x8] sm:$0xff]  ;;  %vm375_vm0 = vcmask 523264  }
   0xc   : > { %404 = vmatpush.bf16.msra.mxu0 %v945_v0  ;;  %s809_s10 = sshll.u32 %s1190_s28, 2  ;;  %v942_v3 = vld [vmem:[%s1182_s1] sm:$0xff]  ;;  %v953_v9 = vld [vmem:[%s1184_s3 + $0x38] sm:$0xff]  ;;  %v952_v11 = vld [vmem:[%s1184_s3 + $0x30] sm:$0xff] }
   0xd   : > { %s1063_s15 = scalar_lea.vmem %s1181_s0, %s809_s10  ;;  %541 = vmatpush.bf16.msra.mxu1 %v953_v9  ;;  %962 = vmatpush.bf16.msra.mxu3 %v953_v9  ;;  %v951_v12 = vld [vmem:[%s1184_s3 + $0x28] sm:$0xff]  ;;  %v950_v13 = vld [vmem:[%s1184_s3 + $0x20] sm:$0xff]  ;;  %v949_v14 = vld [vmem:[%s1184_s3 + $0x18] sm:$0xff]  ;;  %s811_s10 = sshll.u32 %s1190_s28, 3 }
   0xe   : > { %v934_v4 = vld [vmem:[%s1063_s15] sm:$0xff]  ;;  %v935_v5 = vld [vmem:[%s1063_s15 + $0x8] sm:$0xff]  ;;  %v936_v6 = vld [vmem:[%s1063_s15 + $0x10] sm:$0xff] }
   0xf   : > { %v937_v7 = vld [vmem:[%s1063_s15 + $0x18] sm:$0xff]  ;;  %v938_v8 = vld [vmem:[%s1063_s15 + $0x20] sm:$0xff]  ;;  %v939_v10 = vld [vmem:[%s1063_s15 + $0x28] sm:$0xff] }
  0x10   : > { %405 = vmatpush.bf16.msra.mxu0 %v944_v1  ;;  %v940_v15 = vld [vmem:[%s1063_s15 + $0x30] sm:$0xff]  ;;  %v947_v17 = vld [vmem:[%s1184_s3 + $0x8] sm:$0xff]  ;;  %v946_v18 = vld [vmem:[%s1184_s3] sm:$0xff] }
  0x11   : > { %542 = vmatpush.bf16.msra.mxu1 %v952_v11  ;;  %963 = vmatpush.bf16.msra.mxu3 %v952_v11  ;;  %v948_v16 = vld [vmem:[%s1184_s3 + $0x10] sm:$0xff]  ;;  %v941_v19 = vld [vmem:[%s1063_s15 + $0x38] sm:$0xff]  ;;  %v1108_v21 = vld [vmem:[%s1183_s2] ss:$0 sm:$0xff]  ;;  %s1160_s15 = scalar_lea.vmem %s1188_s7, %s811_s10 }
  0x12   : > { %v961_v60 = vld [vmem:[%s1186_s5 + $0x38] sm:$0xff]  ;;  %v960_v0 = vld [vmem:[%s1186_s5 + $0x30] sm:$0xff] }
  0x13   : > { %682 = vmatpush.bf16.msra.mxu2 %v961_v60  ;;  %v956_v11 = vld [vmem:[%s1186_s5 + $0x10] sm:$0xff] }
  0x14   : > { %406 = vmatpush.bf16.msra.mxu0 %v943_v2  ;;  %v959_v2 = vld [vmem:[%s1186_s5 + $0x28] sm:$0xff] }
  0x15   : > { %543 = vmatpush.bf16.msra.mxu1 %v951_v12  ;;  %964 = vmatpush.bf16.msra.mxu3 %v951_v12 }
  0x17   : > { %683 = vmatpush.bf16.msra.mxu2 %v960_v0 }
  0x18   : > { %407 = vmatpush.bf16.msra.mxu0 %v942_v3  ;;  %v958_v3 = vld [vmem:[%s1186_s5 + $0x20] sm:$0xff] }
  0x19   : > { %544 = vmatpush.bf16.msra.mxu1 %v950_v13  ;;  %965 = vmatpush.bf16.msra.mxu3 %v950_v13  ;;  %v955_v13 = vld [vmem:[%s1186_s5 + $0x8] sm:$0xff] }
  0x1b   : > { %860 = vmatmul.msk.bf16.vlgmr.msra.gmra.mxu0 %vm375_vm0, %v934_v4  ;;  %684 = vmatpush.bf16.msra.mxu2 %v959_v2 }
  0x1d   : > { %545 = vmatpush.bf16.msra.mxu1 %v949_v14  ;;  %966 = vmatpush.bf16.msra.mxu3 %v949_v14  ;;  %v954_v14 = vld [vmem:[%s1186_s5] sm:$0xff] }
  0x1f   : > { %685 = vmatpush.bf16.msra.mxu2 %v958_v3 }
  0x21   : > { %546 = vmatpush.bf16.msra.mxu1 %v948_v16  ;;  %967 = vmatpush.bf16.msra.mxu3 %v948_v16 }
  0x25   : > { %547 = vmatpush.bf16.msra.mxu1 %v947_v17  ;;  %968 = vmatpush.bf16.msra.mxu3 %v947_v17 }
  0x29   : > { %548 = vmatpush.bf16.msra.mxu1 %v946_v18  ;;  %969 = vmatpush.bf16.msra.mxu3 %v946_v18 }
  0x2b   : > { %861 = vmatmul.msk.bf16.gmra.mxu0 %vm375_vm0, %v935_v5 }
  0x2d   : > { %970 = vmatpush.bf16.msrb.mxu3 %v961_v60 }
  0x31   : > { %971 = vmatpush.bf16.msrb.mxu3 %v960_v0 }
  0x35   : > { %972 = vmatpush.bf16.msrb.mxu3 %v959_v2 }
  0x39   : > { %973 = vmatpush.bf16.msrb.mxu3 %v958_v3 }
  0x3b   : > { %862 = vmatmul.msk.bf16.gmra.mxu0 %vm375_vm0, %v936_v6 }
  0x4b   : > { %863 = vmatmul.msk.bf16.gmra.mxu0 %vm375_vm0, %v937_v7  ;;  %v957_v7 = vld [vmem:[%s1186_s5 + $0x18] sm:$0xff] }
  0x4c   : > { %686 = vmatpush.bf16.msra.mxu2 %v957_v7  ;;  %974 = vmatpush.bf16.msrb.mxu3 %v957_v7 }
  0x50   : > { %687 = vmatpush.bf16.msra.mxu2 %v956_v11  ;;  %975 = vmatpush.bf16.msrb.mxu3 %v956_v11 }
  0x54   : > { %688 = vmatpush.bf16.msra.mxu2 %v955_v13  ;;  %976 = vmatpush.bf16.msrb.mxu3 %v955_v13 }
  0x58   : > { %689 = vmatpush.bf16.msra.mxu2 %v954_v14  ;;  %977 = vmatpush.bf16.msrb.mxu3 %v954_v14  ;;  %v988_v14 = vld [vmem:[%s1187_s6] ss:$0 sm:$0xff] }
  0x5b   : > { %864 = vmatmul.msk.bf16.gmra.mxu0 %vm375_vm0, %v938_v8 }
  0x6b   : > { %865 = vmatmul.msk.bf16.gmra.mxu0 %vm375_vm0, %v939_v10 }
  0x7b   : > { %866 = vmatmul.msk.bf16.gmra.mxu0 %vm375_vm0, %v940_v15 }
  0x8b   : > { %867 = vmatmul.msk.bf16.gmra.mxu0 %vm375_vm0, %v941_v19 }
  0x98   : > { %v409_v20 = vpop.f32.mrf.mxu0 }
  0x99   : > { %v410_v22 = vadd.f32 %v1108_v21, %v409_v20 }
  0x9b   : > { %v449_v25 = vmax.f32 %v410_v22, 0.0 }
  0xa0   : > { %v411_v23 = vpop.f32.mrf.mxu0 }
  0xa1   : > { %v412_v24 = vadd.f32 %v1108_v21, %v411_v23  ;;  %v987_v23 = vld [vmem:[%s1185_s4] ss:$0 sm:$0xff] }
  0xa3   : > { %v450_v26 = vmax.f32 %v412_v24, 0.0 }
  0xa5   : > { %v465_v27 = vpack.c.bf16 %v450_v26, %v449_v25 }
  0xa7   : > { %549 = vmatmul.bf16.vlgmr.msra.gmra.mxu1 %v465_v27 }
  0xa8   : > { %v414_v28 = vpop.f32.mrf.mxu0 }
  0xa9   : > { %v415_v29 = vadd.f32 %v1108_v21, %v414_v28 }
  0xab   : > { %v451_v32 = vmax.f32 %v415_v29, 0.0 }
  0xb0   : > { %v416_v30 = vpop.f32.mrf.mxu0 }
  0xb1   : > { %v417_v31 = vadd.f32 %v1108_v21, %v416_v30 }
  0xb3   : > { %v452_v33 = vmax.f32 %v417_v31, 0.0 }
  0xb5   : > { %v466_v34 = vpack.c.bf16 %v452_v33, %v451_v32 }
  0xb7   : > { %554 = vmatmul.bf16.gmra.mxu1 %v466_v34 }
  0xb8   : > { %v419_v35 = vpop.f32.mrf.mxu0 }
  0xb9   : > { %v420_v36 = vadd.f32 %v1108_v21, %v419_v35 }
  0xbb   : > { %v453_v39 = vmax.f32 %v420_v36, 0.0 }
  0xc0   : > { %v421_v37 = vpop.f32.mrf.mxu0 }
  0xc1   : > { %v422_v38 = vadd.f32 %v1108_v21, %v421_v37 }
  0xc3   : > { %v454_v40 = vmax.f32 %v422_v38, 0.0 }
  0xc5   : > { %v467_v41 = vpack.c.bf16 %v454_v40, %v453_v39 }
  0xc7   : > { %559 = vmatmul.bf16.gmra.mxu1 %v467_v41 }
  0xc8   : > { %v424_v42 = vpop.f32.mrf.mxu0 }
  0xc9   : > { %v425_v43 = vadd.f32 %v1108_v21, %v424_v42 }
  0xcb   : > { %v455_v46 = vmax.f32 %v425_v43, 0.0 }
  0xd0   : > { %v426_v44 = vpop.f32.mrf.mxu0 }
  0xd1   : > { %v427_v45 = vadd.f32 %v1108_v21, %v426_v44 }
  0xd3   : > { %v456_v47 = vmax.f32 %v427_v45, 0.0 }
  0xd5   : > { %v468_v48 = vpack.c.bf16 %v456_v47, %v455_v46 }
  0xd7   : > { %564 = vmatmul.bf16.gmra.mxu1 %v468_v48 }
  0xd8   : > { %v429_v49 = vpop.f32.mrf.mxu0 }
  0xd9   : > { %v430_v50 = vadd.f32 %v1108_v21, %v429_v49 }
  0xdb   : > { %v457_v53 = vmax.f32 %v430_v50, 0.0 }
  0xe0   : > { %v431_v51 = vpop.f32.mrf.mxu0 }
  0xe1   : > { %v432_v52 = vadd.f32 %v1108_v21, %v431_v51 }
  0xe3   : > { %v458_v54 = vmax.f32 %v432_v52, 0.0 }
  0xe5   : > { %v469_v55 = vpack.c.bf16 %v458_v54, %v457_v53 }
  0xe7   : > { %569 = vmatmul.bf16.gmra.mxu1 %v469_v55 }
  0xe8   : > { %v434_v56 = vpop.f32.mrf.mxu0 }
  0xe9   : > { %v435_v57 = vadd.f32 %v1108_v21, %v434_v56 }
  0xeb   : > { %v459_v61 = vmax.f32 %v435_v57, 0.0 }
  0xf0   : > { %v436_v58 = vpop.f32.mrf.mxu0 }
  0xf1   : > { %v437_v59 = vadd.f32 %v1108_v21, %v436_v58 }
  0xf3   : > { %v460_v62 = vmax.f32 %v437_v59, 0.0 }
  0xf5   : > { %v470_v63 = vpack.c.bf16 %v460_v62, %v459_v61 }
  0xf7   : > { %574 = vmatmul.bf16.gmra.mxu1 %v470_v63 }
  0xf8   : > { %v439_v1 = vpop.f32.mrf.mxu0 }
  0xf9   : > { %v440_v4 = vadd.f32 %v1108_v21, %v439_v1 }
  0xfb   : > { %v461_v8 = vmax.f32 %v440_v4, 0.0 }
 0x100   : > { %v441_v5 = vpop.f32.mrf.mxu0 }
 0x101   : > { %v442_v6 = vadd.f32 %v1108_v21, %v441_v5 }
 0x103   : > { %v462_v9 = vmax.f32 %v442_v6, 0.0 }
 0x105   : > { %v471_v10 = vpack.c.bf16 %v462_v9, %v461_v8 }
 0x107   : > { %579 = vmatmul.bf16.vlgmr.msra.gmra.mxu3 %v471_v10 }
 0x108   : > { %v444_v12 = vpop.f32.mrf.mxu0 }
 0x109   : > { %v445_v15 = vadd.f32 %v1108_v21, %v444_v12 }
 0x10b   : > { %v463_v18 = vmax.f32 %v445_v15, 0.0 }
 0x110   : > { %v446_v16 = vpop.f32.mrf.mxu0 }
 0x111   : > { %v447_v17 = vadd.f32 %v1108_v21, %v446_v16 }
 0x113   : > { %v464_v19 = vmax.f32 %v447_v17, 0.0 }
 0x115   : > { %v472_v20 = vpack.c.bf16 %v464_v19, %v463_v18 }
 0x117   : > { %584 = vmatmul.bf16.gmra.mxu3 %v472_v20 }
 0x124   : > { %v550_v22 = vpop.f32.mrf.mxu1 }
 0x125   : > { %v551_v24 = vadd.f32 %v987_v23, %v550_v22 }
 0x127   : > { %v590_v27 = vmax.f32 %v551_v24, 0.0 }
 0x12c   : > { %v552_v25 = vpop.f32.mrf.mxu1 }
 0x12d   : > { %v553_v26 = vadd.f32 %v987_v23, %v552_v25 }
 0x12f   : > { %v591_v28 = vmax.f32 %v553_v26, 0.0 }
 0x131   : > { %v606_v29 = vpack.c.bf16 %v591_v28, %v590_v27 }
 0x133   : > { %690 = vmatmul.bf16.vlgmr.msra.gmra.mxu2 %v606_v29 }
 0x134   : > { %v555_v30 = vpop.f32.mrf.mxu1 }
 0x135   : > { %v556_v31 = vadd.f32 %v987_v23, %v555_v30 }
 0x137   : > { %v592_v33 = vmax.f32 %v556_v31, 0.0 }
 0x13c   : > { %v557_v32 = vpop.f32.mrf.mxu1 }
 0x13d   : > { %v558_v21 = vadd.f32 %v987_v23, %v557_v32 }
 0x13f   : > { %v593_v34 = vmax.f32 %v558_v21, 0.0 }
 0x141   : > { %v607_v35 = vpack.c.bf16 %v593_v34, %v592_v33 }
 0x143   : > { %695 = vmatmul.bf16.gmra.mxu2 %v607_v35 }
 0x144   : > { %v560_v36 = vpop.f32.mrf.mxu1 }
 0x145   : > { %v561_v37 = vadd.f32 %v987_v23, %v560_v36 }
 0x147   : > { %v594_v40 = vmax.f32 %v561_v37, 0.0 }
 0x14c   : > { %v562_v38 = vpop.f32.mrf.mxu1 }
 0x14d   : > { %v563_v39 = vadd.f32 %v987_v23, %v562_v38 }
 0x14f   : > { %v595_v41 = vmax.f32 %v563_v39, 0.0 }
 0x151   : > { %v608_v42 = vpack.c.bf16 %v595_v41, %v594_v40 }
 0x153   : > { %700 = vmatmul.bf16.gmra.mxu2 %v608_v42 }
 0x154   : > { %v565_v43 = vpop.f32.mrf.mxu1 }
 0x155   : > { %v566_v44 = vadd.f32 %v987_v23, %v565_v43 }
 0x157   : > { %v596_v47 = vmax.f32 %v566_v44, 0.0 }
 0x15c   : > { %v567_v45 = vpop.f32.mrf.mxu1 }
 0x15d   : > { %v568_v46 = vadd.f32 %v987_v23, %v567_v45 }
 0x15f   : > { %v597_v48 = vmax.f32 %v568_v46, 0.0 }
 0x161   : > { %v609_v49 = vpack.c.bf16 %v597_v48, %v596_v47 }
 0x163   : > { %705 = vmatmul.bf16.gmra.mxu2 %v609_v49 }
 0x164   : > { %v570_v50 = vpop.f32.mrf.mxu1 }
 0x165   : > { %v571_v51 = vadd.f32 %v987_v23, %v570_v50 }
 0x167   : > { %v598_v54 = vmax.f32 %v571_v51, 0.0 }
 0x16c   : > { %v572_v52 = vpop.f32.mrf.mxu1 }
 0x16d   : > { %v573_v53 = vadd.f32 %v987_v23, %v572_v52 }
 0x16f   : > { %v599_v55 = vmax.f32 %v573_v53, 0.0 }
 0x171   : > { %v610_v56 = vpack.c.bf16 %v599_v55, %v598_v54 }
 0x173   : > { %710 = vmatmul.bf16.gmra.mxu2 %v610_v56 }
 0x174   : > { %v575_v57 = vpop.f32.mrf.mxu1 }
 0x175   : > { %v576_v58 = vadd.f32 %v987_v23, %v575_v57 }
 0x177   : > { %v600_v61 = vmax.f32 %v576_v58, 0.0 }
 0x17c   : > { %v577_v59 = vpop.f32.mrf.mxu1 }
 0x17d   : > { %v578_v60 = vadd.f32 %v987_v23, %v577_v59 }
 0x17f   : > { %v601_v62 = vmax.f32 %v578_v60, 0.0 }
 0x181   : > { %v611_v63 = vpack.c.bf16 %v601_v62, %v600_v61 }
 0x183   : > { %715 = vmatmul.bf16.gmra.mxu2 %v611_v63 }
 0x18a   : > { %v580_v0 = vpop.f32.mrf.mxu3 }
 0x18b   : > { %v581_v1 = vadd.f32 %v987_v23, %v580_v0 }
 0x18d   : > { %v602_v4 = vmax.f32 %v581_v1, 0.0 }
 0x192   : > { %v582_v2 = vpop.f32.mrf.mxu3 }
 0x193   : > { %v583_v3 = vadd.f32 %v987_v23, %v582_v2 }
 0x195   : > { %v603_v5 = vmax.f32 %v583_v3, 0.0 }
 0x197   : > { %v612_v6 = vpack.c.bf16 %v603_v5, %v602_v4 }
 0x199   : > { %720 = vmatmul.bf16.vlgmr.msrb.gmra.mxu3 %v612_v6 }
 0x19a   : > { %v585_v7 = vpop.f32.mrf.mxu3 }
 0x19b   : > { %v586_v8 = vadd.f32 %v987_v23, %v585_v7 }
 0x19d   : > { %v604_v11 = vmax.f32 %v586_v8, 0.0 }
 0x1a2   : > { %v587_v9 = vpop.f32.mrf.mxu3 }
 0x1a3   : > { %v588_v10 = vadd.f32 %v987_v23, %v587_v9 }
 0x1a5   : > { %v605_v12 = vmax.f32 %v588_v10, 0.0 }
 0x1a7   : > { %v613_v13 = vpack.c.bf16 %v605_v12, %v604_v11 }
 0x1a9   : > { %725 = vmatmul.bf16.gmra.mxu3 %v613_v13 }
 0x1b6   : > { %v691_v15 = vpop.f32.mrf.mxu2 }
 0x1b7   : > { %v692_v16 = vadd.f32 %v988_v14, %v691_v15 }
 0x1b9   : > { %731 = vst [vmem:[%s1160_s15] sm:$0xff] %v692_v16 }
 0x1be   : > { %v693_v17 = vpop.f32.mrf.mxu2 }
 0x1bf   : > { %v694_v18 = vadd.f32 %v988_v14, %v693_v17 }
 0x1c1   : > { %732 = vst [vmem:[%s1160_s15 + $0x8] sm:$0xff] %v694_v18 }
 0x1c6   : > { %v696_v19 = vpop.f32.mrf.mxu2 }
 0x1c7   : > { %v697_v20 = vadd.f32 %v988_v14, %v696_v19 }
 0x1c9   : > { %733 = vst [vmem:[%s1160_s15 + $0x10] sm:$0xff] %v697_v20 }
 0x1ce   : > { %v698_v22 = vpop.f32.mrf.mxu2 }
 0x1cf   : > { %v699_v23 = vadd.f32 %v988_v14, %v698_v22 }
 0x1d1   : > { %734 = vst [vmem:[%s1160_s15 + $0x18] sm:$0xff] %v699_v23 }
 0x1d6   : > { %v701_v24 = vpop.f32.mrf.mxu2 }
 0x1d7   : > { %v702_v25 = vadd.f32 %v988_v14, %v701_v24 }
 0x1d9   : > { %735 = vst [vmem:[%s1160_s15 + $0x20] sm:$0xff] %v702_v25 }
 0x1de   : > { %v703_v26 = vpop.f32.mrf.mxu2 }
 0x1df   : > { %v704_v27 = vadd.f32 %v988_v14, %v703_v26 }
 0x1e1   : > { %736 = vst [vmem:[%s1160_s15 + $0x28] sm:$0xff] %v704_v27 }
 0x1e6   : > { %v706_v28 = vpop.f32.mrf.mxu2 }
 0x1e7   : > { %v707_v29 = vadd.f32 %v988_v14, %v706_v28 }
 0x1e9   : > { %737 = vst [vmem:[%s1160_s15 + $0x30] sm:$0xff] %v707_v29 }
 0x1ee   : > { %v708_v30 = vpop.f32.mrf.mxu2 }
 0x1ef   : > { %v709_v31 = vadd.f32 %v988_v14, %v708_v30 }
 0x1f1   : > { %738 = vst [vmem:[%s1160_s15 + $0x38] sm:$0xff] %v709_v31 }
 0x1f6   : > { %v711_v32 = vpop.f32.mrf.mxu2 }
 0x1f7   : > { %v712_v21 = vadd.f32 %v988_v14, %v711_v32 }
 0x1f9   : > { %739 = vst [vmem:[%s1160_s15 + $0x40] sm:$0xff] %v712_v21 }
 0x1fe   : > { %v713_v33 = vpop.f32.mrf.mxu2 }
 0x1ff   : > { %v714_v34 = vadd.f32 %v988_v14, %v713_v33 }
 0x201   : > { %740 = vst [vmem:[%s1160_s15 + $0x48] sm:$0xff] %v714_v34 }
 0x206   : > { %v716_v35 = vpop.f32.mrf.mxu2 }
 0x207   : > { %v717_v36 = vadd.f32 %v988_v14, %v716_v35 }
 0x209   : > { %741 = vst [vmem:[%s1160_s15 + $0x50] sm:$0xff] %v717_v36 }
 0x20e   : > { %v718_v37 = vpop.f32.mrf.mxu2 }
 0x20f   : > { %v719_v38 = vadd.f32 %v988_v14, %v718_v37 }
 0x211   : > { %742 = vst [vmem:[%s1160_s15 + $0x58] sm:$0xff] %v719_v38 }
 0x21c   : > { %v721_v39 = vpop.f32.mrf.mxu3 }
 0x21d   : > { %v722_v40 = vadd.f32 %v988_v14, %v721_v39 }
 0x21f   : > { %743 = vst [vmem:[%s1160_s15 + $0x60] sm:$0xff] %v722_v40 }
 0x224   : > { %v723_v41 = vpop.f32.mrf.mxu3 }
 0x225   : > { %v724_v42 = vadd.f32 %v988_v14, %v723_v41 }
 0x227   : > { %744 = vst [vmem:[%s1160_s15 + $0x68] sm:$0xff] %v724_v42 }
 0x22c   : > { %v726_v43 = vpop.f32.mrf.mxu3 }
 0x22d   : > { %v727_v44 = vadd.f32 %v988_v14, %v726_v43 }
 0x22f   : > { %745 = vst [vmem:[%s1160_s15 + $0x70] sm:$0xff] %v727_v44 }
 0x234   : > { %v728_v45 = vpop.f32.mrf.mxu3 }
 0x235   : > { %v729_v46 = vadd.f32 %v988_v14, %v728_v45 }
 0x237   : > { %746 = vst [vmem:[%s1160_s15 + $0x78] sm:$0xff] %v729_v46 }
 0x238 PF: > { %s17_s24 = sadd.s32 1, %s995_s24  }
 0x239   : > { %p14_p4 = scmp.ge.s32.totalorder %s17_s24, 4  }
 0x23b   :  { %16 = sbr.rel (!%p14_p4) target bundleno = 1 (0x1), region = 78 }

</bundles_post_ra>
